<compile_context>
chip_gen: v7x
topology: tpu7x:2x2x1
jax: 0.10.0
libtpu: 0.0.40
codegen_flags: <defaults>
</compile_context>

<pallas_src>
import functools

import jax
import jax.numpy as jnp
from jax.experimental import pallas as pl
from jax.experimental.pallas import tpu as pltpu

HIDDEN = 256


def _round_up(n, m):
    return ((n + m - 1) // m) * m


def _choose_tb(batch):
    """Pick the batch tile.

    Small batches: one sublane-aligned tile (bf16 packs 16 sublanes per vreg).
    Large batches: pick TB in {2048,1024,512,256,128} minimizing
    padded_rows + steps * overhead_rows (per-step overhead ~0.35us expressed
    in output-row equivalents), while keeping >= 2 grid steps so the batch
    axis can be sharded across both v7x TensorCores.
    """
    if batch <= 256:
        return _round_up(batch, 16)
    overhead_rows = 128
    best_tb, best_cost = None, None
    for tb in (2048, 1024, 512, 256, 128):
        padded = _round_up(batch, tb)
        steps = padded // tb
        if steps < 2:                      # leave work for the second TC (v7x)
            continue
        cost = padded + steps * overhead_rows
        if best_cost is None or cost < best_cost:
            best_tb, best_cost = tb, cost
    return best_tb


def _actor_kernel(x_ref, w1_ref, b1_ref, w2_ref, b2_ref, wh_ref, bh_ref,
                  out_ref, *, pad):
    # Linear(obs_dim, 256) + ReLU   (bf16 operands, f32 MXU accumulation)
    h1 = jnp.dot(x_ref[...], w1_ref[...], preferred_element_type=jnp.float32)
    h1 = jnp.maximum(h1 + b1_ref[...], 0.0).astype(jnp.bfloat16)
    # Linear(256, 256) + ReLU
    h2 = jnp.dot(h1, w2_ref[...], preferred_element_type=jnp.float32)
    h2 = jnp.maximum(h2 + b2_ref[...], 0.0).astype(jnp.bfloat16)
    # Fused heads: one (256, 2*pad) matmul; lanes [0,pad)=mean, [pad,2*pad)=log_std
    heads = jnp.dot(h2, wh_ref[...], preferred_element_type=jnp.float32) + bh_ref[...]
    if pad % 128 == 0:
        # pad is a clean vreg lane-group boundary: split the stores so
        # exp/clip only touches the std half; mean passes through untouched.
        out_ref[:, :pad] = heads[:, :pad].astype(out_ref.dtype)
        out_ref[:, pad:] = jnp.exp(
            jnp.clip(heads[:, pad:], -20.0, 2.0)).astype(out_ref.dtype)
    else:
        # Single 128-lane slab (pad == 64): per-lane select.  exp on one full
        # vreg costs the same as on half of it, so nothing is wasted.
        lane = jax.lax.broadcasted_iota(jnp.int32, heads.shape, 1)
        std_vals = jnp.exp(jnp.clip(heads, -20.0, 2.0))
        out_ref[...] = jnp.where(lane >= pad, std_vals, heads).astype(out_ref.dtype)


def prepare_actor_params(params):
    """One-time packing of Actor parameters for the kernel.

    Fuses the mean/log_std heads into a single lane-padded weight/bias pair and
    casts matmul operands to bf16.  Call once; reuse the result every forward.
    """
    act_dim = int(params["wm"].shape[1])
    assert act_dim >= 1, "act_dim must be positive"
    # mean|std packed into one 128-lane slab when they fit; otherwise one
    # 128-multiple lane group per head.
    pad = 64 if act_dim <= 64 else _round_up(act_dim, 128)
    slab = 2 * pad

    wh = jnp.zeros((HIDDEN, slab), jnp.float32)
    wh = wh.at[:, :act_dim].set(params["wm"])
    wh = wh.at[:, pad:pad + act_dim].set(params["ws"])
    bh = jnp.zeros((1, slab), jnp.float32)
    bh = bh.at[:, :act_dim].set(params["bm"])
    bh = bh.at[:, pad:pad + act_dim].set(params["bs"])

    arrays = {
        "w1": params["w1"].astype(jnp.bfloat16),
        "b1": params["b1"].astype(jnp.float32),
        "w2": params["w2"].astype(jnp.bfloat16),
        "b2": params["b2"].astype(jnp.float32),
        "wh": wh.astype(jnp.bfloat16),
        "bh": bh,
    }
    return {"arrays": arrays, "act_dim": act_dim, "pad": pad}


@functools.partial(jax.jit, static_argnames=("act_dim", "pad"))
def _actor_forward_impl(x, arrays, act_dim, pad):
    B, obs_dim = x.shape
    slab = 2 * pad

    TB = _choose_tb(B)
    padded_B = _round_up(B, TB)
    if padded_B != B:
        x = jnp.pad(x, ((0, padded_B - B), (0, 0)))
    xb = x.astype(jnp.bfloat16)

    grid = (padded_B // TB,)
    const = lambda i: (0, 0)              # weights/biases VMEM-resident

    flops = 2 * padded_B * (obs_dim * HIDDEN + HIDDEN * HIDDEN + HIDDEN * slab)
    transcendentals = padded_B * (pad if pad % 128 == 0 else slab)
    bytes_accessed = (
        padded_B * obs_dim * 2                                          # x (bf16)
        + (obs_dim * HIDDEN + HIDDEN * HIDDEN + HIDDEN * slab) * 2      # weights (bf16)
        + (2 * HIDDEN + slab) * 4                                       # biases (f32)
        + padded_B * slab * 4                                           # output (f32)
    )

    out = pl.pallas_call(
        functools.partial(_actor_kernel, pad=pad),
        out_shape=jax.ShapeDtypeStruct((padded_B, slab), jnp.float32),
        grid=grid,
        in_specs=[
            pl.BlockSpec((TB, obs_dim), lambda i: (i, 0)),    # x tile
            pl.BlockSpec((obs_dim, HIDDEN), const),           # w1
            pl.BlockSpec((1, HIDDEN), const),                 # b1
            pl.BlockSpec((HIDDEN, HIDDEN), const),            # w2
            pl.BlockSpec((1, HIDDEN), const),                 # b2
            pl.BlockSpec((HIDDEN, slab), const),              # fused head weights
            pl.BlockSpec((1, slab), const),                   # fused head bias
        ],
        out_specs=pl.BlockSpec((TB, slab), lambda i: (i, 0)),
        compiler_params=pltpu.CompilerParams(
            dimension_semantics=("parallel",),
            vmem_limit_bytes=32 * 1024 * 1024,
        ),
        cost_estimate=pl.CostEstimate(
            flops=flops,
            transcendentals=transcendentals,
            bytes_accessed=bytes_accessed,
        ),
    )(xb, arrays["w1"], arrays["b1"], arrays["w2"], arrays["b2"],
      arrays["wh"], arrays["bh"])

    mean = out[:B, :act_dim]
    std = out[:B, pad:pad + act_dim]
    return mean, std


def actor_forward(x, prepared):
    """Run the Actor forward pass.

    x: (B, obs_dim) float32
    prepared: output of prepare_actor_params(params)
    returns: (mean, std), each (B, act_dim) float32
    """
    return _actor_forward_impl(x, prepared["arrays"],
                               prepared["act_dim"], prepared["pad"])


def init_actor_params(key, obs_dim, act_dim):
    """Deterministic PyTorch-style uniform(-1/sqrt(fan_in), 1/sqrt(fan_in)) init."""
    def linear(k, fan_in, fan_out):
        kw, kb = jax.random.split(k)
        bound = 1.0 / jnp.sqrt(fan_in)
        w = jax.random.uniform(kw, (fan_in, fan_out), jnp.float32, -bound, bound)
        b = jax.random.uniform(kb, (1, fan_out), jnp.float32, -bound, bound)
        return w, b

    k1, k2, k3, k4 = jax.random.split(key, 4)
    w1, b1 = linear(k1, obs_dim, HIDDEN)
    w2, b2 = linear(k2, HIDDEN, HIDDEN)
    wm, bm = linear(k3, HIDDEN, act_dim)
    ws, bs = linear(k4, HIDDEN, act_dim)
    return {"w1": w1, "b1": b1, "w2": w2, "b2": b2,
            "wm": wm, "bm": bm, "ws": ws, "bs": bs}


def actor_forward_ref(x, p):
    """Pure-JAX reference matching the kernel's bf16-operand / f32-accumulate math."""
    xb = x.astype(jnp.bfloat16)
    h = jnp.dot(xb, p["w1"].astype(jnp.bfloat16), preferred_element_type=jnp.float32)
    h = jnp.maximum(h + p["b1"], 0.0).astype(jnp.bfloat16)
    h = jnp.dot(h, p["w2"].astype(jnp.bfloat16), preferred_element_type=jnp.float32)
    h = jnp.maximum(h + p["b2"], 0.0).astype(jnp.bfloat16)
    mean = jnp.dot(h, p["wm"].astype(jnp.bfloat16),
                   preferred_element_type=jnp.float32) + p["bm"]
    log_std = jnp.dot(h, p["ws"].astype(jnp.bfloat16),
                      preferred_element_type=jnp.float32) + p["bs"]
    log_std = jnp.clip(log_std, -20.0, 2.0)
    return mean, jnp.exp(log_std)


if __name__ == "__main__":
    key = jax.random.PRNGKey(0)
    k_param, k_x = jax.random.split(key)

    batch, obs_dim, act_dim = 2, 16, 8
    params = init_actor_params(k_param, obs_dim, act_dim)
    prepared = prepare_actor_params(params)          # one-time packing
    x = jax.random.normal(k_x, (batch, obs_dim), jnp.float32)

    mean, std = actor_forward(x, prepared)
    jax.block_until_ready((mean, std))

    mean_ref, std_ref = actor_forward_ref(x, params)
    assert mean.shape == (batch, act_dim) and std.shape == (batch, act_dim)
    assert jnp.allclose(mean, mean_ref, atol=1e-2, rtol=1e-2)
    assert jnp.allclose(std, std_ref, atol=1e-2, rtol=1e-2)
    assert bool(jnp.all(jnp.isfinite(mean))) and bool(jnp.all(std > 0))

    print("KERNEL_OK")
</pallas_src>

<mosaic_0001>
module attributes {stable_mosaic.version = 11 : i64} {
  func.func @_actor_kernel(%arg0: i32, %arg1: memref<16x16xbf16, #tpu.memory_space<vmem>>, %arg2: memref<16x256xbf16, #tpu.memory_space<vmem>>, %arg3: memref<1x256xf32, #tpu.memory_space<vmem>>, %arg4: memref<256x256xbf16, #tpu.memory_space<vmem>>, %arg5: memref<1x256xf32, #tpu.memory_space<vmem>>, %arg6: memref<256x128xbf16, #tpu.memory_space<vmem>>, %arg7: memref<1x128xf32, #tpu.memory_space<vmem>>, %arg8: memref<16x128xf32, #tpu.memory_space<vmem>>) attributes {dimension_semantics = [#tpu.dimension_semantics<parallel>], iteration_bounds = array<i64: 1>, scalar_prefetch = 0 : i64, scratch_operands = 0 : i64, tpu.core_type = #tpu.core_type<tc>, window_params = [{transform_indices = @transform_0, window_bounds = array<i64: 16, 16>}, {pipeline_mode = #tpu.pipeline_mode<synchronous>, transform_indices = @transform_1, window_bounds = array<i64: 16, 256>}, {pipeline_mode = #tpu.pipeline_mode<synchronous>, transform_indices = @transform_2, window_bounds = array<i64: 1, 256>}, {pipeline_mode = #tpu.pipeline_mode<synchronous>, transform_indices = @transform_3, window_bounds = array<i64: 256, 256>}, {pipeline_mode = #tpu.pipeline_mode<synchronous>, transform_indices = @transform_4, window_bounds = array<i64: 1, 256>}, {pipeline_mode = #tpu.pipeline_mode<synchronous>, transform_indices = @transform_5, window_bounds = array<i64: 256, 128>}, {pipeline_mode = #tpu.pipeline_mode<synchronous>, transform_indices = @transform_6, window_bounds = array<i64: 1, 128>}, {transform_indices = @transform_7, window_bounds = array<i64: 16, 128>}]} {
    %c0 = arith.constant 0 : index
    %c0_0 = arith.constant 0 : index
    %0 = vector.load %arg1[%c0, %c0_0] : memref<16x16xbf16, #tpu.memory_space<vmem>>, vector<16x16xbf16>
    %c0_1 = arith.constant 0 : index
    %c0_2 = arith.constant 0 : index
    %1 = vector.load %arg2[%c0_1, %c0_2] : memref<16x256xbf16, #tpu.memory_space<vmem>>, vector<16x256xbf16>
    %cst = arith.constant dense<0.000000e+00> : vector<16x256xf32>
    %2 = tpu.matmul %0, %1, %cst {dimension_numbers = #tpu.dot_dimension_numbers<[1], [0], [0], [1], [0, 0, 1, 1], [], []>} : vector<16x16xbf16>, vector<16x256xbf16>, vector<16x256xf32> -> vector<16x256xf32>
    %c0_3 = arith.constant 0 : index
    %c0_4 = arith.constant 0 : index
    %3 = vector.load %arg3[%c0_3, %c0_4] : memref<1x256xf32, #tpu.memory_space<vmem>>, vector<1x256xf32>
    %4 = vector.broadcast %3 : vector<1x256xf32> to vector<16x256xf32>
    %5 = arith.addf %2, %4 : vector<16x256xf32>
    %cst_5 = arith.constant 0.000000e+00 : f32
    %6 = vector.broadcast %cst_5 : f32 to vector<16x256xf32>
    %7 = arith.maximumf %5, %6 : vector<16x256xf32>
    %8 = arith.truncf %7 : vector<16x256xf32> to vector<16x256xbf16>
    %c0_6 = arith.constant 0 : index
    %c0_7 = arith.constant 0 : index
    %9 = vector.load %arg4[%c0_6, %c0_7] : memref<256x256xbf16, #tpu.memory_space<vmem>>, vector<256x256xbf16>
    %cst_8 = arith.constant dense<0.000000e+00> : vector<16x256xf32>
    %10 = tpu.matmul %8, %9, %cst_8 {dimension_numbers = #tpu.dot_dimension_numbers<[1], [0], [0], [1], [0, 0, 1, 1], [], []>} : vector<16x256xbf16>, vector<256x256xbf16>, vector<16x256xf32> -> vector<16x256xf32>
    %c0_9 = arith.constant 0 : index
    %c0_10 = arith.constant 0 : index
    %11 = vector.load %arg5[%c0_9, %c0_10] : memref<1x256xf32, #tpu.memory_space<vmem>>, vector<1x256xf32>
    %12 = vector.broadcast %11 : vector<1x256xf32> to vector<16x256xf32>
    %13 = arith.addf %10, %12 : vector<16x256xf32>
    %cst_11 = arith.constant 0.000000e+00 : f32
    %14 = vector.broadcast %cst_11 : f32 to vector<16x256xf32>
    %15 = arith.maximumf %13, %14 : vector<16x256xf32>
    %16 = arith.truncf %15 : vector<16x256xf32> to vector<16x256xbf16>
    %c0_12 = arith.constant 0 : index
    %c0_13 = arith.constant 0 : index
    %17 = vector.load %arg6[%c0_12, %c0_13] : memref<256x128xbf16, #tpu.memory_space<vmem>>, vector<256x128xbf16>
    %cst_14 = arith.constant dense<0.000000e+00> : vector<16x128xf32>
    %18 = tpu.matmul %16, %17, %cst_14 {dimension_numbers = #tpu.dot_dimension_numbers<[1], [0], [0], [1], [0, 0, 1, 1], [], []>} : vector<16x256xbf16>, vector<256x128xbf16>, vector<16x128xf32> -> vector<16x128xf32>
    %c0_15 = arith.constant 0 : index
    %c0_16 = arith.constant 0 : index
    %19 = vector.load %arg7[%c0_15, %c0_16] : memref<1x128xf32, #tpu.memory_space<vmem>>, vector<1x128xf32>
    %20 = vector.broadcast %19 : vector<1x128xf32> to vector<16x128xf32>
    %21 = arith.addf %18, %20 : vector<16x128xf32>
    %22 = tpu.iota {dimensions = array<i32: 1>} : vector<16x128xi32>
    %cst_17 = arith.constant -2.000000e+01 : f32
    %cst_18 = arith.constant 2.000000e+00 : f32
    %23 = vector.broadcast %cst_17 : f32 to vector<16x128xf32>
    %24 = arith.maximumf %23, %21 : vector<16x128xf32>
    %25 = vector.broadcast %cst_18 : f32 to vector<16x128xf32>
    %26 = arith.minimumf %25, %24 : vector<16x128xf32>
    %27 = math.exp %26 : vector<16x128xf32>
    %c64_i32 = arith.constant 64 : i32
    %28 = vector.broadcast %c64_i32 : i32 to vector<16x128xi32>
    %29 = arith.cmpi sge, %22, %28 : vector<16x128xi32>
    %30 = arith.select %29, %27, %21 : vector<16x128xi1>, vector<16x128xf32>
    %c0_19 = arith.constant 0 : index
    %c0_20 = arith.constant 0 : index
    %31 = vector.load %arg8[%c0_19, %c0_20] : memref<16x128xf32, #tpu.memory_space<vmem>>, vector<16x128xf32>
    tpu.vector_store %arg8[%c0_19, %c0_20], %30 {strides = array<i32>} : memref<16x128xf32, #tpu.memory_space<vmem>>, vector<16x128xf32>,
    return
  }
  func.func @transform_0(%arg0: i32) -> (i32, i32) {
    %c0_i32 = arith.constant 0 : i32
    %c0_i32_0 = arith.constant 0 : i32
    return %arg0, %c0_i32 : i32, i32
  }
  func.func @transform_1(%arg0: i32) -> (i32, i32) {
    %c0_i32 = arith.constant 0 : i32
    %c0_i32_0 = arith.constant 0 : i32
    %c0_i32_1 = arith.constant 0 : i32
    return %c0_i32, %c0_i32_0 : i32, i32
  }
  func.func @transform_2(%arg0: i32) -> (i32, i32) {
    %c0_i32 = arith.constant 0 : i32
    %c0_i32_0 = arith.constant 0 : i32
    %c0_i32_1 = arith.constant 0 : i32
    return %c0_i32, %c0_i32_0 : i32, i32
  }
  func.func @transform_3(%arg0: i32) -> (i32, i32) {
    %c0_i32 = arith.constant 0 : i32
    %c0_i32_0 = arith.constant 0 : i32
    %c0_i32_1 = arith.constant 0 : i32
    return %c0_i32, %c0_i32_0 : i32, i32
  }
  func.func @transform_4(%arg0: i32) -> (i32, i32) {
    %c0_i32 = arith.constant 0 : i32
    %c0_i32_0 = arith.constant 0 : i32
    %c0_i32_1 = arith.constant 0 : i32
    return %c0_i32, %c0_i32_0 : i32, i32
  }
  func.func @transform_5(%arg0: i32) -> (i32, i32) {
    %c0_i32 = arith.constant 0 : i32
    %c0_i32_0 = arith.constant 0 : i32
    %c0_i32_1 = arith.constant 0 : i32
    return %c0_i32, %c0_i32_0 : i32, i32
  }
  func.func @transform_6(%arg0: i32) -> (i32, i32) {
    %c0_i32 = arith.constant 0 : i32
    %c0_i32_0 = arith.constant 0 : i32
    %c0_i32_1 = arith.constant 0 : i32
    return %c0_i32, %c0_i32_0 : i32, i32
  }
  func.func @transform_7(%arg0: i32) -> (i32, i32) {
    %c0_i32 = arith.constant 0 : i32
    %c0_i32_0 = arith.constant 0 : i32
    return %arg0, %c0_i32 : i32, i32
  }
}

</mosaic_0001>

<bundles_post_ra>
// kernel: _actor_forward_impl.1
= control target key start
LH: loop header
LB: loop body
LE: loop exit
PB: predicated region body
PF: predicated region fallthrough
CT: control target
= control target key end

     0   :  { %12 = vsyncpa [#allocation3], 0  ;;  %s888_s0 = inlined_call_operand.vmem [shape: bf16[16,16], index: 0, kind: input, shape index: {}]   ;;  %s889_s1 = inlined_call_operand.vmem [shape: bf16[16,256], index: 1, kind: input, shape index: {}]   ;;  %s890_s2 = inlined_call_operand.vmem [shape: f32[1,256], index: 2, kind: input, shape index: {}]   ;;  %s891_s3 = inlined_call_operand.hbm [shape: bf16[256,256], index: 3, kind: input, shape index: {}]   ;;  %s892_s4 = inlined_call_operand.vmem [shape: f32[1,256], index: 4, kind: input, shape index: {}]   ;;  %s893_s5 = inlined_call_operand.hbm [shape: bf16[256,128], index: 5, kind: input, shape index: {}]   ;;  %s894_s6 = inlined_call_operand.vmem [shape: f32[1,128], index: 6, kind: input, shape index: {}]   ;;  %s895_s7 = inlined_call_operand.vmem [shape: f32[16,128], index: 7, kind: output, shape index: {}]  }
   0x1   :  { %13 = vsyncpa [#allocation5], 0  ;;  %s791_s24 = smov [#allocation2]   ;;  %s743_s28 = scalar_lea.hbm %s891_s3, 4096 }
   0x2   :  { %s25_s25 = sshll.u32 %s791_s24, 4  ;;  %p744_p0 = scmp.ne.s32.totalorder %s891_s3, %s743_s28  ;;  %s26_s25 = int_to_ptr.vmem [resolvable:$true] %s25_s25 }
   0x3   :  { %p747_p1 = scmp.lt.u32.totalorder %s743_s28, %s891_s3 }
   0x5   :  { %p749_p2 = pnand %p747_p1, %p744_p0 }
   0x7   :  { %752 = shalt.err (!%p749_p2)
}
   0x8   :  { %s753_s10 = scalar_lea.vmem %s26_s25, 4096  ;;  %p758_p4 = scmp.lt.s32.totalorder %s26_s25, %s26_s25 }
   0x9   :  { %p754_p3 = scmp.ne.s32.totalorder %s26_s25, %s753_s10  ;;  %p759_p5 = scmp.lt.s32.totalorder %s753_s10, %s753_s10 }
   0xb   :  { %p760_p6 = por %p759_p5, %p758_p4 }
   0xd   :  { %p761_p7 = pnand %p760_p6, %p754_p3 }
   0xf   :  { %764 = shalt.err (!%p761_p7)
}
  0x10   :  { %s792_s11 = smov 128   ;;  %s793_s12 = smov 8  }
  0x11   :  { %31 = dma.hbm_to_vmem [thread:$0]  %s891_s3, 4096, %s26_s25, [#allocation3], %s792_s11, %s792_s11, %s793_s12  }
  0x12   :  { %s794_s15 = smov [#allocation4]   ;;  %s765_s19 = scalar_lea.hbm %s893_s5, 2048 }
  0x13   :  { %s39_s16 = sshll.u32 %s794_s15, 4  ;;  %p766_p8 = scmp.ne.s32.totalorder %s893_s5, %s765_s19  ;;  %s40_s16 = int_to_ptr.vmem [resolvable:$true] %s39_s16 }
  0x14   :  { %p769_p9 = scmp.lt.u32.totalorder %s765_s19, %s893_s5 }
  0x16   :  { %p771_p10 = pnand %p769_p9, %p766_p8 }
  0x18   :  { %774 = shalt.err (!%p771_p10)
}
  0x19   :  { %s775_s24 = scalar_lea.vmem %s40_s16, 2048  ;;  %p780_p12 = scmp.lt.s32.totalorder %s40_s16, %s40_s16 }
  0x1a   :  { %p776_p11 = scmp.ne.s32.totalorder %s40_s16, %s775_s24  ;;  %p781_p13 = scmp.lt.s32.totalorder %s775_s24, %s775_s24 }
  0x1c   :  { %p782_p0 = por %p781_p13, %p780_p12 }
  0x1e   :  { %p783_p1 = pnand %p782_p0, %p776_p11 }
  0x20   :  { %786 = shalt.err (!%p783_p1)
}
  0x21   :  { %s795_s3 = smov 64   ;;  %s796_s25 = smov 4  }
  0x22   :  { %45 = dma.hbm_to_vmem [thread:$0]  %s893_s5, 2048, %s40_s16, [#allocation5], %s795_s3, %s795_s3, %s796_s25  }
  0x23   :  { %787 = dma.done.wait [#allocation3], 4096  }
  0x24   :  { %788 = vsyncadd [#allocation3], 4294963200 }
  0x25   :  { %789 = dma.done.wait [#allocation5], 2048  }
  0x26   :  { %790 = vsyncadd [#allocation5], 4294965248  ;;  %v797_v0 = vmov 0   ;;  %v671_v1 = vld [vmem:[%s889_s1 + $0x4] ss:$8 sps:$4 sm:$0xff]   ;;  %vm86_vm0 = vcmask 130048   ;;  %v61_v47 = vlaneseq }
  0x27   :  { %122 = vmatprep.mubr.bf16.mxu0 %v797_v0  ;;  %v673_v2 = vld [vmem:[%s889_s1] ss:$8 sps:$4 sm:$0xff]   ;;  %90 = vmatprep.subr.bf16.mxu0 %v671_v1  ;;  %v675_v4 = vld [vmem:[#allocation2 + $0x4] ss:$8 sps:$4 sm:$0xff]   ;;  %v678_v6 = vld [vmem:[#allocation2 + $0x14] ss:$8 sps:$4 sm:$0xff]  }
  0x28   :  { %v674_v3 = vld [vmem:[%s888_s0] sm:$0xff]   ;;  %91 = vmatpush1.bf16.msra.mxu0 %v673_v2  ;;  %343 = vmatprep.subr.bf16.mxu1 %v675_v4  ;;  %v680_v7 = vld [vmem:[#allocation2 + $0x10] ss:$8 sps:$4 sm:$0xff]   ;;  %v684_v10 = vld [vmem:[#allocation2 + $0x34] ss:$8 sps:$4 sm:$0xff]   ;;  %v62_v48 = vshrl.u32 %v61_v47, 7 }
  0x29   :  { %v677_v5 = vld [vmem:[#allocation2] ss:$8 sps:$4 sm:$0xff]   ;;  %v681_v8 = vld [vmem:[#allocation2 + $0x24] ss:$8 sps:$4 sm:$0xff]   ;;  %v686_v11 = vld [vmem:[#allocation2 + $0x30] ss:$8 sps:$4 sm:$0xff]  }
  0x2a   :  { %344 = vmatpush1.bf16.msra.mxu1 %v677_v5  ;;  %v683_v9 = vld [vmem:[#allocation2 + $0x20] ss:$8 sps:$4 sm:$0xff]   ;;  %v687_v12 = vld [vmem:[#allocation2 + $0x44] ss:$8 sps:$4 sm:$0xff]   ;;  %v690_v14 = vld [vmem:[#allocation2 + $0x54] ss:$8 sps:$4 sm:$0xff]  }
  0x2b   :  { %592 = vmatmul.mubr.msk.bf16.vlgmr.msra.gmra.mrb[0].mxu0 %vm86_vm0, %v674_v3  ;;  %345 = vmatprep.subr.bf16.mxu1 %v678_v6  ;;  %v689_v13 = vld [vmem:[#allocation2 + $0x40] ss:$8 sps:$4 sm:$0xff]   ;;  %v692_v15 = vld [vmem:[#allocation2 + $0x50] ss:$8 sps:$4 sm:$0xff]   ;;  %v693_v16 = vld [vmem:[#allocation2 + $0x64] ss:$8 sps:$4 sm:$0xff]  }
  0x2c   :  { %v695_v17 = vld [vmem:[#allocation2 + $0x60] ss:$8 sps:$4 sm:$0xff]   ;;  %v696_v18 = vld [vmem:[#allocation2 + $0x74] ss:$8 sps:$4 sm:$0xff]   ;;  %v698_v19 = vld [vmem:[#allocation2 + $0x70] ss:$8 sps:$4 sm:$0xff]  }
  0x2d   :  { %v699_v20 = vld [vmem:[#allocation2 + $0x84] ss:$8 sps:$4 sm:$0xff]   ;;  %v701_v21 = vld [vmem:[#allocation2 + $0x80] ss:$8 sps:$4 sm:$0xff]   ;;  %v702_v22 = vld [vmem:[#allocation2 + $0x94] ss:$8 sps:$4 sm:$0xff]  }
  0x2e   :  { %346 = vmatpush1.bf16.msra.mxu1 %v680_v7  ;;  %v704_v23 = vld [vmem:[#allocation2 + $0x90] ss:$8 sps:$4 sm:$0xff]   ;;  %v705_v24 = vld [vmem:[#allocation2 + $0xa4] ss:$8 sps:$4 sm:$0xff]   ;;  %v707_v25 = vld [vmem:[#allocation2 + $0xa0] ss:$8 sps:$4 sm:$0xff]  }
  0x2f   :  { %347 = vmatprep.subr.bf16.mxu1 %v681_v8  ;;  %v708_v26 = vld [vmem:[#allocation2 + $0xb4] ss:$8 sps:$4 sm:$0xff]   ;;  %v710_v27 = vld [vmem:[#allocation2 + $0xb0] ss:$8 sps:$4 sm:$0xff]   ;;  %v711_v28 = vld [vmem:[#allocation2 + $0xc4] ss:$8 sps:$4 sm:$0xff]  }
  0x30   :  { %v713_v29 = vld [vmem:[#allocation2 + $0xc0] ss:$8 sps:$4 sm:$0xff]   ;;  %v714_v30 = vld [vmem:[#allocation2 + $0xd4] ss:$8 sps:$4 sm:$0xff]   ;;  %v716_v31 = vld [vmem:[#allocation2 + $0xd0] ss:$8 sps:$4 sm:$0xff]  }
  0x31   :  { %v717_v32 = vld [vmem:[#allocation2 + $0xe4] ss:$8 sps:$4 sm:$0xff]   ;;  %v719_v33 = vld [vmem:[#allocation2 + $0xe0] ss:$8 sps:$4 sm:$0xff]   ;;  %v720_v34 = vld [vmem:[#allocation2 + $0xf4] ss:$8 sps:$4 sm:$0xff]  }
  0x32   :  { %348 = vmatpush1.bf16.msra.mxu1 %v683_v9  ;;  %v722_v35 = vld [vmem:[#allocation2 + $0xf0] ss:$8 sps:$4 sm:$0xff]   ;;  %v723_v36 = vld [vmem:[#allocation4 + $0x40] sm:$0xff]   ;;  %v725_v38 = vld [vmem:[#allocation4 + $0x48] sm:$0xff]   ;;  %v63_v49 = vsub.s32 0, %v62_v48  ;;  %v67_v51 = vsub.s32 1, %v62_v48 }
  0x33   :  { %349 = vmatprep.subr.bf16.mxu1 %v684_v10  ;;  %v724_v37 = vld [vmem:[#allocation4] sm:$0xff]   ;;  %642 = vmatprep.subr.bf16.mxu0 %v723_v36  ;;  %v726_v39 = vld [vmem:[#allocation4 + $0x8] sm:$0xff]   ;;  %v727_v40 = vld [vmem:[#allocation4 + $0x50] sm:$0xff]  }
  0x34   :  { %643 = vmatpush3.bf16.msra.mxu0 %v724_v37  ;;  %v728_v41 = vld [vmem:[#allocation4 + $0x10] sm:$0xff]   ;;  %v729_v42 = vld [vmem:[#allocation4 + $0x58] sm:$0xff]   ;;  %v731_v44 = vld [vmem:[#allocation4 + $0x60] sm:$0xff]  }
  0x35   :  { %644 = vmatprep.subr.bf16.mxu0 %v725_v38  ;;  %v730_v43 = vld [vmem:[#allocation4 + $0x18] sm:$0xff]   ;;  %v732_v45 = vld [vmem:[#allocation4 + $0x20] sm:$0xff]   ;;  %v733_v46 = vld [vmem:[#allocation4 + $0x68] sm:$0xff]  }
  0x36   :  { %350 = vmatpush1.bf16.msra.mxu1 %v686_v11  ;;  %v59_v50 = vld [vmem:[%s890_s2] sm:$0x3]  ;;  %v734_v4 = vld [vmem:[#allocation4 + $0x28] sm:$0xff]   ;;  %v735_v5 = vld [vmem:[#allocation4 + $0x70] sm:$0xff]  }
  0x37   :  { %351 = vmatprep.subr.bf16.mxu1 %v687_v12  ;;  %v64_v52 = vrot.slane %v59_v50, %v63_v49  ;;  %v68_v53 = vrot.slane %v59_v50, %v67_v51  ;;  %v736_v6 = vld [vmem:[#allocation4 + $0x30] sm:$0xff]   ;;  %v737_v7 = vld [vmem:[#allocation4 + $0x78] sm:$0xff]   ;;  %v171_v9 = vld [vmem:[%s892_s4] sm:$0x3] }
  0x38   :  { %645 = vmatpush3.bf16.msra.mxu0 %v726_v39  ;;  %v738_v8 = vld [vmem:[#allocation4 + $0x38] sm:$0xff]   ;;  %v176_v10 = vrot.slane %v171_v9, %v63_v49  ;;  %v180_v11 = vrot.slane %v171_v9, %v67_v51 }
  0x39   :  { %646 = vmatprep.subr.bf16.mxu0 %v727_v40 }
  0x3a   :  { %352 = vmatpush1.bf16.msra.mxu1 %v689_v13 }
  0x3b   :  { %353 = vmatprep.subr.bf16.mxu1 %v690_v14 }
  0x3c   :  { %647 = vmatpush3.bf16.msra.mxu0 %v728_v41  ;;  %v569_v41 = vand.u32 127, %v61_v47 }
  0x3d   :  { %648 = vmatprep.subr.bf16.mxu0 %v729_v42 }
  0x3e   :  { %354 = vmatpush1.bf16.msra.mxu1 %v692_v15  ;;  %vm578_vm1 = vcmp.ge.s32.totalorder %v569_v41, 64 }
  0x3f   :  { %355 = vmatprep.subr.bf16.mxu1 %v693_v16 }
  0x40   :  { %649 = vmatpush3.bf16.msra.mxu0 %v730_v43 }
  0x41   :  { %650 = vmatprep.subr.bf16.mxu0 %v731_v44 }
  0x42   :  { %356 = vmatpush1.bf16.msra.mxu1 %v695_v17 }
  0x43   :  { %357 = vmatprep.subr.bf16.mxu1 %v696_v18 }
  0x44   :  { %651 = vmatpush3.bf16.msra.mxu0 %v732_v45 }
  0x45   :  { %652 = vmatprep.subr.bf16.mxu0 %v733_v46 }
  0x46   :  { %358 = vmatpush1.bf16.msra.mxu1 %v698_v19 }
  0x47   :  { %359 = vmatprep.subr.bf16.mxu1 %v699_v20 }
  0x48   :  { %653 = vmatpush3.bf16.msra.mxu0 %v734_v4 }
  0x49   :  { %654 = vmatprep.subr.bf16.mxu0 %v735_v5 }
  0x4a   :  { %360 = vmatpush1.bf16.msra.mxu1 %v701_v21 }
  0x4b   :  { %361 = vmatprep.subr.bf16.mxu1 %v702_v22 }
  0x4c   :  { %655 = vmatpush3.bf16.msra.mxu0 %v736_v6 }
  0x4d   :  { %656 = vmatprep.subr.bf16.mxu0 %v737_v7 }
  0x4e   :  { %362 = vmatpush1.bf16.msra.mxu1 %v704_v23 }
  0x4f   :  { %363 = vmatprep.subr.bf16.mxu1 %v705_v24 }
  0x50   :  { %657 = vmatpush3.bf16.msra.mxu0 %v738_v8 }
  0x52   :  { %364 = vmatpush1.bf16.msra.mxu1 %v707_v25 }
  0x53   :  { %365 = vmatprep.subr.bf16.mxu1 %v708_v26 }
  0x56   :  { %366 = vmatpush1.bf16.msra.mxu1 %v710_v27  ;;  %v625_v27 = vld [vmem:[%s894_s6] ss:$0 sm:$0xff] }
  0x57   :  { %367 = vmatprep.subr.bf16.mxu1 %v711_v28 }
  0x5a   :  { %368 = vmatpush1.bf16.msra.mxu1 %v713_v29 }
  0x5b   :  { %369 = vmatprep.subr.bf16.mxu1 %v714_v30 }
  0x5e   :  { %370 = vmatpush1.bf16.msra.mxu1 %v716_v31 }
  0x5f   :  { %371 = vmatprep.subr.bf16.mxu1 %v717_v32 }
  0x62   :  { %372 = vmatpush1.bf16.msra.mxu1 %v719_v33 }
  0x63   :  { %373 = vmatprep.subr.bf16.mxu1 %v720_v34 }
  0x66   :  { %374 = vmatpush1.bf16.msra.mxu1 %v722_v35 }
  0xfe   :  { %v124_v54 = vpop.f32.mrb[0].mxu0 }
  0xff   :  { %v125_v55 = vadd.f32 %v124_v54, %v64_v52  ;;  %v126_v56 = vpop.f32.mrb[1].mxu0 }
 0x100   :  { %v127_v57 = vadd.f32 %v126_v56, %v68_v53  ;;  %v128_v58 = vpop.f32.mrb[2].mxu0 }
 0x101   :  { %v129_v59 = vadd.f32 %v128_v58, %v64_v52  ;;  %v130_v60 = vpop.f32.mrb[3].mxu0  ;;  %v133_v62 = vmax.f32 %v125_v55, 0.0 }
 0x102   :  { %v131_v61 = vadd.f32 %v130_v60, %v68_v53  ;;  %v134_v0 = vmax.f32 %v127_v57, 0.0 }
 0x103   :  { %v135_v63 = vmax.f32 %v129_v59, 0.0 }
 0x104   :  { %v136_v1 = vmax.f32 %v131_v61, 0.0 }
 0x105   :  { %v137_v2 = vpack.c.bf16 %v135_v63, %v133_v62 }
 0x106   :  { %v138_v3 = vpack.c.bf16 %v136_v1, %v134_v0 }
 0x108   :  { %375 = vmatprep.mubr.bf16.mxu1 %v138_v3 }
 0x109   :  { %376 = vmatmul.mubr.bf16.vlgmr.msra.gmra.mrb[0].mxu1 %v137_v2 }
 0x1dc   :  { %v377_v12 = vpop.f32.mrb[0].mxu1 }
 0x1dd   :  { %v378_v13 = vadd.f32 %v377_v12, %v176_v10  ;;  %v379_v14 = vpop.f32.mrb[1].mxu1 }
 0x1de   :  { %v380_v15 = vadd.f32 %v379_v14, %v180_v11  ;;  %v381_v16 = vpop.f32.mrb[2].mxu1 }
 0x1df   :  { %v382_v17 = vadd.f32 %v381_v16, %v176_v10  ;;  %v383_v18 = vpop.f32.mrb[3].mxu1  ;;  %v386_v20 = vmax.f32 %v378_v13, 0.0 }
 0x1e0   :  { %v384_v19 = vadd.f32 %v383_v18, %v180_v11  ;;  %v387_v22 = vmax.f32 %v380_v15, 0.0 }
 0x1e1   :  { %v388_v21 = vmax.f32 %v382_v17, 0.0 }
 0x1e2   :  { %v389_v23 = vmax.f32 %v384_v19, 0.0 }
 0x1e3   :  { %v390_v24 = vpack.c.bf16 %v388_v21, %v386_v20 }
 0x1e4   :  { %v391_v25 = vpack.c.bf16 %v389_v23, %v387_v22 }
 0x1e6   :  { %559 = vmatprep.mubr.bf16.mxu0 %v391_v25 }
 0x1e7   :  { %560 = vmatmul.mubr.bf16.vlgmr.msra.gmra.mrb[4].mxu0 %v390_v24 }
 0x2ba   :  { %v658_v26 = vpop.f32.mrb[4].mxu0 }
 0x2bb   :  { %v659_v28 = vpop.f32.mrb[5].mxu0 }
 0x2bc   :  { %v660_v29 = vadd.f32 %v659_v28, %v658_v26  ;;  %v661_v30 = vpop.f32.mrb[6].mxu0 }
 0x2bd   :  { %v662_v31 = vpop.f32.mrb[7].mxu0 }
 0x2be   :  { %v562_v32 = vadd.f32 %v660_v29, %v625_v27  ;;  %v663_v33 = vadd.f32 %v662_v31, %v661_v30 }
 0x2c0   :  { %v570_v34 = vmax.f32 %v562_v32, -20.0  ;;  %v565_v35 = vadd.f32 %v663_v33, %v625_v27 }
 0x2c2   :  { %v572_v36 = vmin.f32 %v570_v34, 2.0  ;;  %v571_v37 = vmax.f32 %v565_v35, -20.0 }
 0x2c4   :  { %v574_v38 = vmul.f32 1.442695, %v572_v36  ;;  %v573_v39 = vmin.f32 %v571_v37, 2.0 }
 0x2c6   :  { %739 = vpow2.f32 %v574_v38  ;;  %v576_v40 = vmul.f32 1.442695, %v573_v39 }
 0x2c8   :  { %741 = vpow2.f32 %v576_v40 }
 0x2d0   :  { %v740_v42 = vpop.eup %739 }
 0x2d1   :  { %v579_v43 = vsel %vm578_vm1, %v740_v42, %v562_v32 }
 0x2d2   :  { %v742_v44 = vpop.eup %741  ;;  %581 = vst [vmem:[%s895_s7] sm:$0xff] %v579_v43 }
 0x2d3   :  { %v580_v45 = vsel %vm578_vm1, %v742_v44, %v565_v35 }
 0x2d4   :  { %582 = vst [vmem:[%s895_s7 + $0x8] sm:$0xff] %v580_v45 }
 0x2d5   :  { %587 = vsyncpa [#allocation3], 1 }
 0x2d6   :  { %588 = vsyncpa [#allocation5], 1 }

</bundles_post_ra>
